<compile_context>
chip_gen: v6e
topology: v6e:2x2x1
jax: 0.10.0
libtpu: 0.0.40
codegen_flags: <defaults>
</compile_context>

<pallas_src>
import jax
import jax.numpy as jnp
from jax import lax
from jax.experimental import pallas as pl
from jax.experimental.pallas import tpu as pltpu

LANES = 128                # TPU lane width (last dim)
SUBLANES = 8               # f32 sublane count (accumulator rows)
ALIGN = SUBLANES * LANES   # 1024: slab granularity for the zero-copy (R,128) view
CHUNK_ROWS = 512           # in-kernel chunk (256 KiB f32): bounds vreg live ranges


def _device_kind():
    try:
        return jax.devices()[0].device_kind.lower()
    except Exception:
        return ""


def _num_tensorcores():
    # v7x has 2 TensorCores per chip (a "parallel" grid axis shards across
    # them); v5e / v6e have a single TensorCore, where a core split is pure
    # overhead for a mem-bound kernel.
    return 2 if "v7" in _device_kind() else 1


def _target_block_bytes():
    # Per-block HBM->VMEM DMA size. v7x's ~3.2 TB/s HBM needs ~4 MiB blocks to
    # keep DMA time >= ~1 us per step (amortizing fixed per-step cost); 2 MiB
    # already reaches ~85%+ of HBM roofline on v5e/v6e and keeps the
    # double-buffered footprint well under every scoped-VMEM default.
    return (4 << 20) if "v7" in _device_kind() else (2 << 20)


def _make_sumsq_kernel(*, tr, nblk, spc, rem_last, need_mask, need_skip):
    """Accumulate sum(x*x) of this core's row blocks into an (8,128) partial."""
    nfull = tr // CHUNK_ROWS
    tail = tr - nfull * CHUNK_ROWS

    def kernel(x_ref, part_ref):
        i = pl.program_id(1)

        # Reset the resident output block at the start of each core's segment.
        @pl.when(i == 0)
        def _():
            part_ref[...] = jnp.zeros_like(part_ref)

        b = pl.program_id(0) * spc + i          # logical row-block id

        def accumulate():
            if need_mask:
                # Rows at/above `limit` in this block are beyond the slab
                # (ragged last block) and must not contribute.
                limit = jnp.where(b == nblk - 1, rem_last, tr)
            else:
                limit = None

            def chunk_sumsq(start, rows):
                x = x_ref[pl.ds(start, rows), :].astype(jnp.float32)
                if limit is not None:
                    row = start + lax.broadcasted_iota(jnp.int32, (rows, LANES), 0)
                    x = jnp.where(row < limit, x, 0.0)
                x = x * x
                # (rows,128)->(rows//8,8,128) matches the native vreg tiling,
                # so the axis-0 sum is vreg-wise VPU adds only (no XLU).
                return jnp.sum(x.reshape(rows // SUBLANES, SUBLANES, LANES), axis=0)

            acc = jnp.zeros((SUBLANES, LANES), jnp.float32)
            if nfull > 0:
                def body(j, a):
                    start = pl.multiple_of(j * CHUNK_ROWS, CHUNK_ROWS)
                    return a + chunk_sumsq(start, CHUNK_ROWS)
                acc = lax.fori_loop(0, nfull, body, acc)
            if tail:
                acc = acc + chunk_sumsq(nfull * CHUNK_ROWS, tail)
            part_ref[...] += acc

        if need_skip:
            # With an uneven split of row blocks across cores, the trailing
            # grid step(s) of the last core map (clamped) onto an already
            # processed block; skip them so nothing is double counted.
            pl.when(b < nblk)(accumulate)
        else:
            accumulate()

    return kernel


def prior_loss_from_flat(flat, prior_std=1.0, observed=1.0, *,
                         ncores=None, block_rows=None):
    """sum(flat**2) / prior_std^2 / observed for a 1-D slab (f32 / bf16 / ...)."""
    flat = jnp.asarray(flat).reshape(-1)
    n = int(flat.shape[0])
    scale = 1.0 / (float(prior_std) * float(prior_std) * float(observed))
    if n == 0:
        return jnp.zeros((), jnp.float32)

    # Zero-copy path needs the slab length to be a multiple of 8*128 so it can
    # be viewed as (R,128) with R % 8 == 0.  prior_loss() sizes its concat so
    # this always holds; only raw, unaligned slabs pay this zero-tail append.
    pad = (-n) % ALIGN
    if pad:
        flat = jnp.concatenate([flat, jnp.zeros((pad,), flat.dtype)])
    rows = (n + pad) // LANES                   # multiple of 8, >= 8
    x2d = flat.reshape(rows, LANES)

    itemsize = flat.dtype.itemsize
    if block_rows is None:
        tr = _target_block_bytes() // (LANES * itemsize)
    else:
        tr = int(block_rows)
    tr = max(SUBLANES, (tr // SUBLANES) * SUBLANES)
    tr = min(tr, rows)                          # both multiples of 8

    nblk = pl.cdiv(rows, tr)                    # total row blocks
    nc = _num_tensorcores() if ncores is None else int(ncores)
    nc = max(1, min(nc, nblk))
    spc = pl.cdiv(nblk, nc)                     # row blocks per core
    rem_last = rows - (nblk - 1) * tr           # valid rows in the last block
    need_mask = rem_last != tr
    need_skip = nc * spc > nblk

    kernel = _make_sumsq_kernel(tr=tr, nblk=nblk, spc=spc, rem_last=rem_last,
                                need_mask=need_mask, need_skip=need_skip)

    parts = pl.pallas_call(
        kernel,
        out_shape=jax.ShapeDtypeStruct((nc, SUBLANES, LANES), jnp.float32),
        grid_spec=pltpu.PrefetchScalarGridSpec(
            num_scalar_prefetch=0,
            grid=(nc, spc),
            in_specs=[
                pl.BlockSpec(
                    (tr, LANES),
                    lambda c, i: (jnp.minimum(c * spc + i, nblk - 1), 0)),
            ],
            out_specs=pl.BlockSpec((None, SUBLANES, LANES),
                                   lambda c, i: (c, 0, 0)),
        ),
        compiler_params=pltpu.CompilerParams(
            # Core axis parallel (2 TCs on v7x); row-block axis is the reduction.
            dimension_semantics=("parallel", "arbitrary"),
        ),
        cost_estimate=pl.CostEstimate(
            flops=2 * rows * LANES,
            transcendentals=0,
            bytes_accessed=rows * LANES * itemsize + nc * SUBLANES * LANES * 4,
        ),
    )(x2d)

    # Tiny final reduction (nc*8*128 elems) + constant scale in the wrapper.
    return jnp.sum(parts) * scale


def prior_loss(params, prior_std=1.0, observed=1.0):
    """params: iterable of jnp arrays (any shapes / float dtypes)."""
    params = [jnp.asarray(p) for p in params]
    if not params:
        return jnp.zeros((), jnp.float32)
    dtype = jnp.result_type(*params)
    if not jnp.issubdtype(dtype, jnp.floating):
        dtype = jnp.float32
    # Keep the params' own dtype (bf16 stays bf16 -> half the HBM traffic) and
    # fold the lane/sublane alignment tail into the single required concat, so
    # there is no separate jnp.pad / f32-upcast pass over the slab.
    pieces = [p.reshape(-1).astype(dtype) for p in params]
    n = sum(int(p.shape[0]) for p in pieces)
    pad = (-n) % ALIGN
    if pad:
        pieces.append(jnp.zeros((pad,), dtype))
    flat = jnp.concatenate(pieces)
    return prior_loss_from_flat(flat, prior_std=prior_std, observed=observed)


class PriorLoss:
    """Drop-in port of the PyTorch PriorLoss module (forward semantics only)."""

    def __init__(self, prior_std=1.0, observed=None):
        self.prior_std = prior_std
        self.observed = observed

    def __call__(self, params, observed=None):
        if observed is None:
            observed = self.observed
        return prior_loss(params, prior_std=self.prior_std, observed=observed)


if __name__ == "__main__":
    key = jax.random.PRNGKey(0)
    k1, k2, k3, k4 = jax.random.split(key, 4)

    # Deterministic synthetic "model parameters" (a small MLP).
    params = [
        jax.random.normal(k1, (32, 16), dtype=jnp.float32),   # layer-1 weight
        jax.random.normal(k2, (32,), dtype=jnp.float32),       # layer-1 bias
        jax.random.normal(k3, (4, 32), dtype=jnp.float32),     # layer-2 weight
        jax.random.normal(k4, (4,), dtype=jnp.float32),        # layer-2 bias
    ]
    prior_std, observed = 1.5, 100.0
    loss = jax.block_until_ready(PriorLoss(prior_std, observed)(params))
    ref = sum(jnp.sum(p * p / (prior_std * prior_std)) for p in params) / observed
    assert jnp.allclose(loss, ref, rtol=1e-5, atol=1e-6), (loss, ref)

    # Multi-block path with a ragged last row-block: exercises large DMA tiles,
    # the chunked inner reduction and the in-kernel tail masking (zero-copy slab).
    n_big = (3 * 4096 + 8) * 128
    big = jax.random.normal(jax.random.PRNGKey(1), (n_big,), dtype=jnp.float32)
    got = jax.block_until_ready(prior_loss_from_flat(big, prior_std=2.0, observed=10.0))
    want = jnp.sum(big * big) / 4.0 / 10.0
    assert jnp.allclose(got, want, rtol=1e-5, atol=1e-5), (got, want)

    # bf16 slab fed directly (half the HBM traffic), upcast in-kernel.
    nb = 4096 * 128
    xb = jax.random.normal(jax.random.PRNGKey(2), (nb,), jnp.float32).astype(jnp.bfloat16)
    got_b = jax.block_until_ready(prior_loss_from_flat(xb, prior_std=1.0, observed=7.0))
    want_b = jnp.sum(xb.astype(jnp.float32) ** 2) / 7.0
    assert jnp.allclose(got_b, want_b, rtol=1e-4, atol=1e-3), (got_b, want_b)

    # Forced 2-core split with an odd number of row blocks: exercises the
    # clamped index_map + duplicated-block skip used for the v7x TC split.
    n_odd = 3 * 64 * 128
    xo = jax.random.normal(jax.random.PRNGKey(3), (n_odd,), dtype=jnp.float32)
    got_o = jax.block_until_ready(
        prior_loss_from_flat(xo, prior_std=1.0, observed=1.0, ncores=2, block_rows=64))
    want_o = jnp.sum(xo * xo)
    assert jnp.allclose(got_o, want_o, rtol=1e-5, atol=1e-5), (got_o, want_o)

    # Odd-length raw slab (hits the documented small alignment-tail path).
    xr = jax.random.normal(jax.random.PRNGKey(4), (10_000,), dtype=jnp.float32)
    got_r = jax.block_until_ready(prior_loss_from_flat(xr, prior_std=0.5, observed=3.0))
    want_r = jnp.sum(xr * xr) / 0.25 / 3.0
    assert jnp.allclose(got_r, want_r, rtol=1e-5, atol=1e-5), (got_r, want_r)

    print("KERNEL_OK")
</pallas_src>

<mosaic_0001>
module attributes {stable_mosaic.version = 11 : i64} {
  func.func @kernel(%arg0: i32, %arg1: i32, %arg2: memref<8x128xf32, #tpu.memory_space<vmem>>, %arg3: memref<1x8x128xf32, #tpu.memory_space<vmem>>) attributes {dimension_semantics = [#tpu.dimension_semantics<parallel>, #tpu.dimension_semantics<arbitrary>], iteration_bounds = array<i64: 1, 1>, scalar_prefetch = 0 : i64, scratch_operands = 0 : i64, tpu.core_type = #tpu.core_type<tc>, window_params = [{transform_indices = @transform_0, window_bounds = array<i64: 8, 128>}, {transform_indices = @transform_1, window_bounds = array<i64: 1, 8, 128>}]} {
    %c0_i32 = arith.constant 0 : i32
    %0 = arith.cmpi eq, %arg1, %c0_i32 : i32
    %1 = arith.extui %0 : i1 to i32
    %c0_i32_0 = arith.constant 0 : i32
    %2 = arith.cmpi ne, %1, %c0_i32_0 : i32
    scf.if %2 {
      %cst_9 = arith.constant 0.000000e+00 : f32
      %15 = vector.broadcast %cst_9 : f32 to vector<8x128xf32>
      %c0_10 = arith.constant 0 : index
      %c0_11 = arith.constant 0 : index
      %c0_12 = arith.constant 0 : index
      %16 = vector.load %arg3[%c0_10, %c0_11, %c0_12] : memref<1x8x128xf32, #tpu.memory_space<vmem>>, vector<1x8x128xf32>
      %17 = vector.shape_cast %16 : vector<1x8x128xf32> to vector<8x128xf32>
      %18 = vector.shape_cast %15 : vector<8x128xf32> to vector<1x8x128xf32>
      tpu.vector_store %arg3[%c0_10, %c0_11, %c0_12], %18 {strides = array<i32>} : memref<1x8x128xf32, #tpu.memory_space<vmem>>, vector<1x8x128xf32>,
    } else {
    }
    %cst = arith.constant 0.000000e+00 : f32
    %3 = vector.broadcast %cst : f32 to vector<8x128xf32>
    %c0 = arith.constant 0 : index
    %c0_1 = arith.constant 0 : index
    %4 = vector.load %arg2[%c0, %c0_1] : memref<8x128xf32, #tpu.memory_space<vmem>>, vector<8x128xf32>
    %5 = arith.mulf %4, %4 : vector<8x128xf32>
    %6 = vector.shape_cast %5 : vector<8x128xf32> to vector<1x8x128xf32>
    %cst_2 = arith.constant dense<0.000000e+00> : vector<8x128xf32>
    %7 = vector.multi_reduction <add>, %6, %cst_2 [0] : vector<1x8x128xf32> to vector<8x128xf32>
    %8 = arith.addf %3, %7 : vector<8x128xf32>
    %c0_3 = arith.constant 0 : index
    %c0_4 = arith.constant 0 : index
    %c0_5 = arith.constant 0 : index
    %9 = vector.load %arg3[%c0_3, %c0_4, %c0_5] : memref<1x8x128xf32, #tpu.memory_space<vmem>>, vector<1x8x128xf32>
    %10 = vector.shape_cast %9 : vector<1x8x128xf32> to vector<8x128xf32>
    %11 = arith.addf %10, %8 : vector<8x128xf32>
    %c0_6 = arith.constant 0 : index
    %c0_7 = arith.constant 0 : index
    %c0_8 = arith.constant 0 : index
    %12 = vector.load %arg3[%c0_6, %c0_7, %c0_8] : memref<1x8x128xf32, #tpu.memory_space<vmem>>, vector<1x8x128xf32>
    %13 = vector.shape_cast %12 : vector<1x8x128xf32> to vector<8x128xf32>
    %14 = vector.shape_cast %11 : vector<8x128xf32> to vector<1x8x128xf32>
    tpu.vector_store %arg3[%c0_6, %c0_7, %c0_8], %14 {strides = array<i32>} : memref<1x8x128xf32, #tpu.memory_space<vmem>>, vector<1x8x128xf32>,
    return
  }
  func.func @transform_0(%arg0: i32, %arg1: i32) -> (i32, i32) {
    %c1_i32 = arith.constant 1 : i32
    %0 = arith.muli %arg0, %c1_i32 : i32
    %1 = arith.addi %0, %arg1 : i32
    %c0_i32 = arith.constant 0 : i32
    %2 = arith.minsi %1, %c0_i32 : i32
    %c0_i32_0 = arith.constant 0 : i32
    %c0_i32_1 = arith.constant 0 : i32
    return %2, %c0_i32_0 : i32, i32
  }
  func.func @transform_1(%arg0: i32, %arg1: i32) -> (i32, i32, i32) {
    %c0_i32 = arith.constant 0 : i32
    %c0_i32_0 = arith.constant 0 : i32
    %c0_i32_1 = arith.constant 0 : i32
    return %arg0, %c0_i32, %c0_i32_0 : i32, i32, i32
  }
}

</mosaic_0001>

<bundles_post_ra>
// kernel: tpu_custom_call.1
= control target key start
LH: loop header
LB: loop body
LE: loop exit
PB: predicated region body
PF: predicated region fallthrough
CT: control target
= control target key end

     0   :  { %6 = vsyncpa [#allocation3], 0  ;;  %s123_s0 = inlined_call_operand.hbm [shape: f32[8,128], index: 0, kind: input, shape index: {}]   ;;  %s124_s1 = inlined_call_operand.hbm [shape: f32[1,8,128], index: 1, kind: output, shape index: {}]  }
   0x1   :  { %7 = vsyncpa [#allocation4], 0  ;;  %s105_s6 = smov [#allocation2]  }
   0x2   :  { %s19_s7 = sshll.u32 %s105_s6, 4  ;;  %s20_s7 = int_to_ptr.vmem [resolvable:$true] %s19_s7 }
   0x3   :  { %s69_s8 = scalar_lea.vmem %s20_s7, 128  ;;  %p74_p1 = scmp.lt.s32.totalorder %s20_s7, %s20_s7 }
   0x4   :  { %p70_p0 = scmp.ne.s32.totalorder %s20_s7, %s69_s8  ;;  %p75_p2 = scmp.lt.s32.totalorder %s69_s8, %s69_s8 }
   0x6   :  { %p76_p3 = por %p75_p2, %p74_p1 }
   0x8   :  { %p77_p4 = pnand %p76_p3, %p70_p0 }
   0xa   :  { %80 = shalt.err (!%p77_p4)
}
   0xb   :  { %22 = dma.hbm_to_vmem [thread:$0]  %s123_s0, 128, %s20_s7, [#allocation3]  }
   0xc   :  { %101 = dma.done.wait [#allocation3], 128  }
   0xd   :  { %102 = vsyncadd [#allocation3], 4294967168  ;;  %v34_v0 = vld [vmem:[#allocation2] sm:$0xff]  ;;  %s106_s11 = smov [#allocation5]  }
   0xe   :  { %s47_s12 = sshll.u32 %s106_s11, 4  ;;  %v35_v1 = vmul.f32 %v34_v0, %v34_v0  ;;  %s48_s12 = int_to_ptr.vmem [resolvable:$true] %s47_s12 }
   0xf   :  { %s81_s13 = scalar_lea.vmem %s48_s12, 128  ;;  %p86_p6 = scmp.lt.s32.totalorder %s48_s12, %s48_s12 }
  0x10   :  { %40 = vst [vmem:[#allocation5] sm:$0xff] %v35_v1  ;;  %p82_p5 = scmp.ne.s32.totalorder %s48_s12, %s81_s13  ;;  %p87_p7 = scmp.lt.s32.totalorder %s81_s13, %s81_s13 }
  0x12   :  { %p88_p8 = por %p87_p7, %p86_p6 }
  0x14   :  { %p89_p9 = pnand %p88_p8, %p82_p5 }
  0x16   :  { %92 = shalt.err (!%p89_p9)
}
  0x17   :  { %50 = dma.vmem_to_hbm [thread:$0]  %s48_s12, 128, %s124_s1, [#allocation4]  }
  0x18   :  { %103 = dma.done.wait [#allocation4], 128  }
  0x19   :  { %104 = vsyncadd [#allocation4], 4294967168 }
  0x1a   :  { %54 = vsyncpa [#allocation3], 1 }
  0x1b   :  { %55 = vsyncpa [#allocation4], 1 }

</bundles_post_ra>
